<compile_context>
chip_gen: v7x
topology: tpu7x:2x2x1
jax: 0.10.0
libtpu: 0.0.40
codegen_flags: <defaults>
</compile_context>

<pallas_src>
import functools
import numpy as np
import jax
import jax.numpy as jnp
from jax import lax
from jax.experimental import pallas as pl
from jax.experimental.pallas import tpu as pltpu


# ----------------------------- fused Pallas kernel ---------------------------

def _fused_decoder_kernel(z_ref, w_ref, o_ref, *, layout, chain, inv_tau):
    """Entire Decoder forward for one batch block; everything stays on-chip.

    z_ref : (block_b, z_dim)          latent block
    w_ref : (R, 256) f32 slab         all weights/biases/head matrices packed
    o_ref : (block_b, out_cols)       lane-dense log-prob slab (pos-major, vocab-minor)
    """
    f32 = jnp.float32

    def blk(name):                       # static slice into the weight slab
        r0, nr, nc = layout[name]
        return w_ref[r0:r0 + nr, :nc]

    # Affine chain: z_to_first, middle Linears, (last Linear folded into the
    # first deconv block matrix), remaining deconv block matrices.  Every
    # affine after the first is preceded by a ReLU (Dropout p=0, no batch-norm);
    # the ConvTranspose1d stride-scatter is folded into the packed matrices.
    x = z_ref[...]
    for idx, (wn, bn) in enumerate(chain):
        if idx > 0:
            x = jnp.maximum(x, 0.0)
        x = jnp.dot(x, blk(wn), preferred_element_type=f32) + blk(bn)

    # Decode head (x is (block_b, n_pos*E), position-major / embed-minor lanes).
    # Per-position squared norms via one block-of-ones matmul, broadcast back
    # onto each position's E lanes.
    ss = jnp.dot(x * x, blk("snorm"), preferred_element_type=f32)
    xn = x * lax.rsqrt(jnp.maximum(ss, 1e-24))          # == x / max(||x||, 1e-12)

    # All positions' logits in one block-diagonal matmul (padded to 256 lanes).
    logits = jnp.dot(xn, blk("eblk"), preferred_element_type=f32) * inv_tau

    # Log-softmax per position over the vocab lanes: subtract the global row
    # max (valid upper bound for every segment -> exact per-segment lse), then
    # get per-position exp-sums with one block-of-ones matmul.  The padded
    # 32-lane block has its own ones block so its lse stays finite; the wrapper
    # slices those lanes off.
    m = jnp.max(logits, axis=-1, keepdims=True)
    e = jnp.exp(logits - m)
    seg = jnp.dot(e, blk("texp"), preferred_element_type=f32)
    o_ref[...] = logits - (m + jnp.log(seg))            # single lane-dense store


# --------------------------- params / weights --------------------------------

class DecoderParams:
    conv_mode = 1                  # ConvMode.D1
    z_dim = 16
    embed_dim = 16
    vocab_size = 32
    linear_dims = [32]
    num_filters = [8, 8]
    kernel_sizes = [3, 3]
    strides = [2, 2]
    output_paddings = [0, 0]
    do_batch_norm = False
    dropout_ratio = 0.0
    tau = 0.5


def init_decoder_weights(key, p):
    """Deterministic synthetic weights (shapes mirror the torch module)."""
    ks = jax.random.split(key, 16)
    w = {}
    lin_dims = p.linear_dims[::-1] + [p.num_filters[-1]]
    w["z_to_first_w"] = jax.random.normal(ks[0], (lin_dims[0], p.z_dim)) * 0.2
    w["z_to_first_b"] = jnp.full((lin_dims[0],), 0.01, jnp.float32)
    w["lin_w"], w["lin_b"] = [], []
    for i in range(len(lin_dims) - 1):
        w["lin_w"].append(jax.random.normal(ks[1 + i], (lin_dims[i + 1], lin_dims[i])) * 0.2)
        w["lin_b"].append(jnp.full((lin_dims[i + 1],), 0.01, jnp.float32))
    L = len(p.kernel_sizes)
    out_channels = [p.embed_dim] + list(p.num_filters)
    w["deconv"] = []
    for j, i in enumerate(range(L - 1, -1, -1)):      # forward application order
        cin, cout, k = p.num_filters[i], out_channels[i], p.kernel_sizes[i]
        wt = jax.random.normal(ks[8 + j], (cin, cout, k)) * 0.2   # torch (Cin,Cout,K)
        bt = jax.random.normal(ks[12 + j], (cout,)) * 0.05
        w["deconv"].append(dict(w=wt, b=bt, stride=p.strides[i],
                                out_pad=p.output_paddings[i]))
    w["embedding"] = jax.random.uniform(ks[15], (p.vocab_size, p.embed_dim),
                                        minval=-0.001, maxval=0.001)
    return w


# --------------------------- one-time host packing ---------------------------

def _deconv_block_matrix(w_torch, stride, out_pad, lin):
    """Fold ConvTranspose1d (weight + stride scatter) into a dense matrix.

    Input lanes  : t*Cin + ci   (position-major, channel-minor)
    Output lanes : p*Cout + co  with p = t*stride + k; overlapping taps sum
    naturally inside the matmul (the scatter-add lives in the weight).
    """
    cin, cout, k = w_torch.shape
    lout = (lin - 1) * stride + k + out_pad
    m = np.zeros((lin * cin, lout * cout), np.float32)
    for t in range(lin):
        for kk in range(k):
            pos = t * stride + kk
            m[t * cin:(t + 1) * cin, pos * cout:(pos + 1) * cout] = w_torch[:, :, kk]
    return m, lout, cout


def _pack_slab(mats):
    """Pack named 2-D matrices into one (R, 128k) f32 slab, 8-aligned rows."""
    width = max(int(m.shape[1]) for _, m in mats)
    width = ((width + 127) // 128) * 128
    layout, blocks = {}, []
    cur = 0
    for name, m in mats:
        cur = ((cur + 7) // 8) * 8
        r, c = m.shape
        layout[name] = (cur, int(r), int(c))
        blocks.append((cur, m))
        cur += r
    total = ((cur + 7) // 8) * 8
    slab = np.zeros((total, width), np.float32)
    for off, m in blocks:
        slab[off:off + m.shape[0], :m.shape[1]] = m
    return jnp.asarray(slab), layout


def prepare_decoder(weights, p):
    """Pack all weights once on the host into a single slab + static layout."""
    E, V = p.embed_dim, p.vocab_size

    # Linear stack (torch weight is (out, in)); store transposed (in, out).
    lin_ws = [np.asarray(weights["z_to_first_w"], np.float32).T]
    lin_bs = [np.asarray(weights["z_to_first_b"], np.float32).reshape(1, -1)]
    for wl, bl in zip(weights["lin_w"], weights["lin_b"]):
        lin_ws.append(np.asarray(wl, np.float32).T)
        lin_bs.append(np.asarray(bl, np.float32).reshape(1, -1))

    # Deconv block matrices (X.view(B, C, 1) -> Lin starts at 1).
    dec_ws, dec_bs = [], []
    lin_len = 1
    for d in weights["deconv"]:
        m, lout, cout = _deconv_block_matrix(np.asarray(d["w"], np.float32),
                                             d["stride"], d["out_pad"], lin_len)
        dec_ws.append(m)
        dec_bs.append(np.tile(np.asarray(d["b"], np.float32), lout).reshape(1, lout * cout))
        lin_len = lout
    n_pos = lin_len

    # Fold the last Linear into the first deconv matrix (no nonlinearity between).
    w_fold = lin_ws[-1] @ dec_ws[0]
    b_fold = lin_bs[-1] @ dec_ws[0] + dec_bs[0]
    aff_ws = lin_ws[:-1] + [w_fold] + dec_ws[1:]
    aff_bs = lin_bs[:-1] + [b_fold] + dec_bs[1:]

    # Head matrices: segment-sum for norms, block-diagonal embedding for logits,
    # segment-sum over vocab for the softmax denominator.  Output columns are
    # padded to a multiple of 128 for a lane-dense store; the padded 32-lane
    # block gets its own ones block in `texp` so its lse stays finite.
    out_cols = ((n_pos * V + 127) // 128) * 128
    snorm = np.zeros((n_pos * E, n_pos * E), np.float32)
    eblk = np.zeros((n_pos * E, out_cols), np.float32)
    texp = np.zeros((out_cols, out_cols), np.float32)
    embT = np.asarray(weights["embedding"], np.float32).T      # (E, V)
    for pp in range(n_pos):
        snorm[pp * E:(pp + 1) * E, pp * E:(pp + 1) * E] = 1.0
        eblk[pp * E:(pp + 1) * E, pp * V:(pp + 1) * V] = embT
        texp[pp * V:(pp + 1) * V, pp * V:(pp + 1) * V] = 1.0
    if out_cols > n_pos * V:
        texp[n_pos * V:, n_pos * V:] = 1.0

    mats, chain = [], []
    for i, (wm, bm) in enumerate(zip(aff_ws, aff_bs)):
        mats.append((f"aff{i}_w", wm))
        mats.append((f"aff{i}_b", bm))
        chain.append((f"aff{i}_w", f"aff{i}_b"))
    mats += [("snorm", snorm), ("eblk", eblk), ("texp", texp)]
    slab, layout = _pack_slab(mats)

    return dict(slab=slab, layout=layout, chain=tuple(chain),
                n_pos=n_pos, vocab=V, embed_dim=E, z_dim=p.z_dim,
                out_cols=out_cols, tau=float(p.tau))


# ------------------------------- forward -------------------------------------

def decoder_forward(z, prep, block_b=8):
    """Single fused pallas_call over a (padded) batch grid.

    Batch is padded to a multiple of `block_b` (8) so f32 sublanes / MXU rows
    are filled; the batch grid axis is marked "parallel" so multi-TensorCore
    parts (v7x) can split it.  All weights arrive as ONE slab (one DMA), which
    is revisited (no re-fetch) across grid steps.
    """
    B = z.shape[0]
    B_pad = ((max(B, block_b) + block_b - 1) // block_b) * block_b
    zp = jnp.pad(z.astype(jnp.float32), ((0, B_pad - B), (0, 0)))

    slab = prep["slab"]
    R, W = slab.shape
    out_cols = prep["out_cols"]
    z_dim = prep["z_dim"]

    kernel = functools.partial(_fused_decoder_kernel,
                               layout=prep["layout"], chain=prep["chain"],
                               inv_tau=1.0 / prep["tau"])

    out = pl.pallas_call(
        kernel,
        out_shape=jax.ShapeDtypeStruct((B_pad, out_cols), jnp.float32),
        grid=(B_pad // block_b,),
        in_specs=[pl.BlockSpec((block_b, z_dim), lambda i: (i, 0)),
                  pl.BlockSpec((R, W), lambda i: (0, 0))],
        out_specs=pl.BlockSpec((block_b, out_cols), lambda i: (i, 0)),
        compiler_params=pltpu.CompilerParams(dimension_semantics=("parallel",)),
    )(zp, slab)

    n_pos, V = prep["n_pos"], prep["vocab"]
    return out[:B, :n_pos * V].reshape(B, n_pos, V)


# --------------------------- pure-JAX reference ------------------------------

def decoder_reference(z, weights, p):
    B = z.shape[0]
    x = z @ weights["z_to_first_w"].T + weights["z_to_first_b"]
    for wl, bl in zip(weights["lin_w"], weights["lin_b"]):
        x = jnp.maximum(x, 0.0) @ wl.T + bl
    x = x.reshape(B, p.num_filters[-1], 1)
    n = len(weights["deconv"])
    for idx, d in enumerate(weights["deconv"]):
        wt, bt, s = d["w"], d["b"], d["stride"]
        Cin, Cout, K = wt.shape
        Lin = x.shape[2]
        Lout = (Lin - 1) * s + K + d["out_pad"]
        out = jnp.zeros((B, Cout, Lout), jnp.float32)
        for k in range(K):
            contrib = jnp.einsum("bct,co->bot", x, wt[:, :, k])
            for t in range(Lin):
                out = out.at[:, :, t * s + k].add(contrib[:, :, t])
        x = out + bt[None, :, None]
        if idx < n - 1:
            x = jnp.maximum(x, 0.0)
    norm = jnp.maximum(jnp.linalg.norm(x, axis=1, keepdims=True), 1e-12)
    xn = x / norm
    logits = jnp.einsum("ve,bes->bvs", weights["embedding"], xn) / p.tau
    logp = jax.nn.log_softmax(logits, axis=1)
    return jnp.transpose(logp, (0, 2, 1))


if __name__ == "__main__":
    p = DecoderParams()
    key = jax.random.PRNGKey(0)
    wkey, zkey = jax.random.split(key)
    weights = init_decoder_weights(wkey, p)
    prep = prepare_decoder(weights, p)

    batch = 2
    z = jax.random.normal(zkey, (batch, p.z_dim), dtype=jnp.float32)

    out = jax.block_until_ready(decoder_forward(z, prep))
    ref = jax.block_until_ready(decoder_reference(z, weights, p))
    assert out.shape == ref.shape == (batch, 7, p.vocab_size), out.shape
    np.testing.assert_allclose(np.asarray(out), np.asarray(ref), rtol=1e-3, atol=1e-3)

    print("KERNEL_OK")
</pallas_src>

<mosaic_0001>
module attributes {stable_mosaic.version = 11 : i64} {
  func.func @_fused_decoder_kernel(%arg0: i32, %arg1: memref<8x16xf32, #tpu.memory_space<vmem>>, %arg2: memref<576x256xf32, #tpu.memory_space<vmem>>, %arg3: memref<8x256xf32, #tpu.memory_space<vmem>>) attributes {dimension_semantics = [#tpu.dimension_semantics<parallel>], iteration_bounds = array<i64: 1>, scalar_prefetch = 0 : i64, scratch_operands = 0 : i64, tpu.core_type = #tpu.core_type<tc>, window_params = [{transform_indices = @transform_0, window_bounds = array<i64: 8, 16>}, {pipeline_mode = #tpu.pipeline_mode<synchronous>, transform_indices = @transform_1, window_bounds = array<i64: 576, 256>}, {transform_indices = @transform_2, window_bounds = array<i64: 8, 256>}]} {
    %c0 = arith.constant 0 : index
    %c0_0 = arith.constant 0 : index
    %0 = vector.load %arg1[%c0, %c0_0] : memref<8x16xf32, #tpu.memory_space<vmem>>, vector<8x16xf32>
    %c0_1 = arith.constant 0 : index
    %c0_2 = arith.constant 0 : index
    %1 = vector.load %arg2[%c0_1, %c0_2] : memref<576x256xf32, #tpu.memory_space<vmem>>, vector<16x32xf32>
    %cst = arith.constant dense<0.000000e+00> : vector<8x32xf32>
    %2 = tpu.matmul %0, %1, %cst {dimension_numbers = #tpu.dot_dimension_numbers<[1], [0], [0], [1], [0, 0, 1, 1], [], []>} : vector<8x16xf32>, vector<16x32xf32>, vector<8x32xf32> -> vector<8x32xf32>
    %c16 = arith.constant 16 : index
    %c0_3 = arith.constant 0 : index
    %3 = vector.load %arg2[%c16, %c0_3] : memref<576x256xf32, #tpu.memory_space<vmem>>, vector<1x32xf32>
    %4 = vector.broadcast %3 : vector<1x32xf32> to vector<8x32xf32>
    %5 = arith.addf %2, %4 : vector<8x32xf32>
    %cst_4 = arith.constant 0.000000e+00 : f32
    %6 = vector.broadcast %cst_4 : f32 to vector<8x32xf32>
    %7 = arith.maximumf %5, %6 : vector<8x32xf32>
    %c24 = arith.constant 24 : index
    %c0_5 = arith.constant 0 : index
    %8 = vector.load %arg2[%c24, %c0_5] : memref<576x256xf32, #tpu.memory_space<vmem>>, vector<32x24xf32>
    %cst_6 = arith.constant dense<0.000000e+00> : vector<8x24xf32>
    %9 = tpu.matmul %7, %8, %cst_6 {dimension_numbers = #tpu.dot_dimension_numbers<[1], [0], [0], [1], [0, 0, 1, 1], [], []>} : vector<8x32xf32>, vector<32x24xf32>, vector<8x24xf32> -> vector<8x24xf32>
    %c56 = arith.constant 56 : index
    %c0_7 = arith.constant 0 : index
    %10 = vector.load %arg2[%c56, %c0_7] : memref<576x256xf32, #tpu.memory_space<vmem>>, vector<1x24xf32>
    %11 = vector.broadcast %10 : vector<1x24xf32> to vector<8x24xf32>
    %12 = arith.addf %9, %11 : vector<8x24xf32>
    %cst_8 = arith.constant 0.000000e+00 : f32
    %13 = vector.broadcast %cst_8 : f32 to vector<8x24xf32>
    %14 = arith.maximumf %12, %13 : vector<8x24xf32>
    %c64 = arith.constant 64 : index
    %c0_9 = arith.constant 0 : index
    %15 = vector.load %arg2[%c64, %c0_9] : memref<576x256xf32, #tpu.memory_space<vmem>>, vector<24x112xf32>
    %cst_10 = arith.constant dense<0.000000e+00> : vector<8x112xf32>
    %16 = tpu.matmul %14, %15, %cst_10 {dimension_numbers = #tpu.dot_dimension_numbers<[1], [0], [0], [1], [0, 0, 1, 1], [], []>} : vector<8x24xf32>, vector<24x112xf32>, vector<8x112xf32> -> vector<8x112xf32>
    %c88 = arith.constant 88 : index
    %c0_11 = arith.constant 0 : index
    %17 = vector.load %arg2[%c88, %c0_11] : memref<576x256xf32, #tpu.memory_space<vmem>>, vector<1x112xf32>
    %18 = vector.broadcast %17 : vector<1x112xf32> to vector<8x112xf32>
    %19 = arith.addf %16, %18 : vector<8x112xf32>
    %20 = arith.mulf %19, %19 : vector<8x112xf32>
    %c96 = arith.constant 96 : index
    %c0_12 = arith.constant 0 : index
    %21 = vector.load %arg2[%c96, %c0_12] : memref<576x256xf32, #tpu.memory_space<vmem>>, vector<112x112xf32>
    %cst_13 = arith.constant dense<0.000000e+00> : vector<8x112xf32>
    %22 = tpu.matmul %20, %21, %cst_13 {dimension_numbers = #tpu.dot_dimension_numbers<[1], [0], [0], [1], [0, 0, 1, 1], [], []>} : vector<8x112xf32>, vector<112x112xf32>, vector<8x112xf32> -> vector<8x112xf32>
    %cst_14 = arith.constant 1.000000e-24 : f32
    %23 = vector.broadcast %cst_14 : f32 to vector<8x112xf32>
    %24 = arith.maximumf %22, %23 : vector<8x112xf32>
    %25 = math.rsqrt %24 : vector<8x112xf32>
    %26 = arith.mulf %19, %25 : vector<8x112xf32>
    %c208 = arith.constant 208 : index
    %c0_15 = arith.constant 0 : index
    %27 = vector.load %arg2[%c208, %c0_15] : memref<576x256xf32, #tpu.memory_space<vmem>>, vector<112x256xf32>
    %cst_16 = arith.constant dense<0.000000e+00> : vector<8x256xf32>
    %28 = tpu.matmul %26, %27, %cst_16 {dimension_numbers = #tpu.dot_dimension_numbers<[1], [0], [0], [1], [0, 0, 1, 1], [], []>} : vector<8x112xf32>, vector<112x256xf32>, vector<8x256xf32> -> vector<8x256xf32>
    %cst_17 = arith.constant 2.000000e+00 : f32
    %29 = vector.broadcast %cst_17 : f32 to vector<8x256xf32>
    %30 = arith.mulf %28, %29 : vector<8x256xf32>
    %cst_18 = arith.constant dense<0xFF800000> : vector<8xf32>
    %31 = vector.multi_reduction <maximumf>, %30, %cst_18 [1] : vector<8x256xf32> to vector<8xf32>
    %32 = vector.shape_cast %31 : vector<8xf32> to vector<8x1xf32>
    %33 = vector.broadcast %32 : vector<8x1xf32> to vector<8x256xf32>
    %34 = arith.subf %30, %33 : vector<8x256xf32>
    %35 = math.exp %34 : vector<8x256xf32>
    %c320 = arith.constant 320 : index
    %c0_19 = arith.constant 0 : index
    %36 = vector.load %arg2[%c320, %c0_19] : memref<576x256xf32, #tpu.memory_space<vmem>>, vector<256x256xf32>
    %cst_20 = arith.constant dense<0.000000e+00> : vector<8x256xf32>
    %37 = tpu.matmul %35, %36, %cst_20 {dimension_numbers = #tpu.dot_dimension_numbers<[1], [0], [0], [1], [0, 0, 1, 1], [], []>} : vector<8x256xf32>, vector<256x256xf32>, vector<8x256xf32> -> vector<8x256xf32>
    %38 = math.log %37 : vector<8x256xf32>
    %39 = vector.broadcast %32 : vector<8x1xf32> to vector<8x256xf32>
    %40 = arith.addf %39, %38 : vector<8x256xf32>
    %41 = arith.subf %30, %40 : vector<8x256xf32>
    %c0_21 = arith.constant 0 : index
    %c0_22 = arith.constant 0 : index
    %42 = vector.load %arg3[%c0_21, %c0_22] : memref<8x256xf32, #tpu.memory_space<vmem>>, vector<8x256xf32>
    tpu.vector_store %arg3[%c0_21, %c0_22], %41 {strides = array<i32>} : memref<8x256xf32, #tpu.memory_space<vmem>>, vector<8x256xf32>,
    return
  }
  func.func @transform_0(%arg0: i32) -> (i32, i32) {
    %c0_i32 = arith.constant 0 : i32
    %c0_i32_0 = arith.constant 0 : i32
    return %arg0, %c0_i32 : i32, i32
  }
  func.func @transform_1(%arg0: i32) -> (i32, i32) {
    %c0_i32 = arith.constant 0 : i32
    %c0_i32_0 = arith.constant 0 : i32
    %c0_i32_1 = arith.constant 0 : i32
    return %c0_i32, %c0_i32_0 : i32, i32
  }
  func.func @transform_2(%arg0: i32) -> (i32, i32) {
    %c0_i32 = arith.constant 0 : i32
    %c0_i32_0 = arith.constant 0 : i32
    return %arg0, %c0_i32 : i32, i32
  }
}

</mosaic_0001>

<bundles_post_ra>
// kernel: tpu_custom_call.1
= control target key start
LH: loop header
LB: loop body
LE: loop exit
PB: predicated region body
PF: predicated region fallthrough
CT: control target
= control target key end

     0   :  { %7 = vsyncpa [#allocation3], 0  ;;  %s1040_s0 = inlined_call_operand.hbm [shape: f32[8,16], index: 0, kind: input, shape index: {}]   ;;  %s1041_s1 = inlined_call_operand.hbm [shape: f32[576,256], index: 1, kind: input, shape index: {}]   ;;  %s1042_s2 = inlined_call_operand.hbm [shape: f32[8,256], index: 2, kind: output, shape index: {}]  }
   0x1   :  { %8 = vsyncpa [#allocation6], 0 }
   0x2   :  { %9 = vsyncpa [#allocation4], 0  ;;  %s946_s9 = smov [#allocation2]   ;;  %s947_s11 = smov [#allocation5]  }
   0x3   :  { %s16_s10 = sshll.u32 %s946_s9, 4  ;;  %s25_s12 = sshll.u32 %s947_s11, 4  ;;  %s17_s10 = int_to_ptr.vmem [resolvable:$true] %s16_s10  ;;  %s969_s12 = int_to_ptr.vmem [resolvable:$true] %s25_s12 }
   0x4   :  { %s874_s15 = scalar_lea.hbm %s1040_s0, 128 }
   0x5   :  { %p875_p0 = scmp.ne.s32.totalorder %s1040_s0, %s874_s15  ;;  %p878_p1 = scmp.lt.u32.totalorder %s874_s15, %s1040_s0 }
   0x7   :  { %p880_p2 = pnand %p878_p1, %p875_p0 }
   0x9   :  { %883 = shalt.err (!%p880_p2)
}
   0xa   :  { %s884_s20 = scalar_lea.vmem %s17_s10, 128  ;;  %p889_p4 = scmp.lt.s32.totalorder %s17_s10, %s17_s10 }
   0xb   :  { %p885_p3 = scmp.ne.s32.totalorder %s17_s10, %s884_s20  ;;  %p890_p5 = scmp.lt.s32.totalorder %s884_s20, %s884_s20 }
   0xd   :  { %p891_p6 = por %p890_p5, %p889_p4 }
   0xf   :  { %p892_p7 = pnand %p891_p6, %p885_p3 }
  0x11   :  { %895 = shalt.err (!%p892_p7)
}
  0x12   :  { %19 = dma.hbm_to_vmem [thread:$0]  %s1040_s0, 128, %s17_s10, [#allocation3]  }
  0x13   :  { %s896_s25 = scalar_lea.hbm %s1041_s1, 18432 }
  0x14   :  { %p897_p8 = scmp.ne.s32.totalorder %s1041_s1, %s896_s25  ;;  %p900_p9 = scmp.lt.u32.totalorder %s896_s25, %s1041_s1 }
  0x16   :  { %p902_p10 = pnand %p900_p9, %p897_p8 }
  0x18   :  { %905 = shalt.err (!%p902_p10)
}
  0x19   :  { %s906_s30 = scalar_lea.vmem %s969_s12, 18432  ;;  %p911_p12 = scmp.lt.s32.totalorder %s969_s12, %s969_s12 }
  0x1a   :  { %p907_p11 = scmp.ne.s32.totalorder %s969_s12, %s906_s30  ;;  %p912_p13 = scmp.lt.s32.totalorder %s906_s30, %s906_s30 }
  0x1c   :  { %p913_p0 = por %p912_p13, %p911_p12 }
  0x1e   :  { %p914_p1 = pnand %p913_p0, %p907_p11 }
  0x20   :  { %917 = shalt.err (!%p914_p1)
}
  0x21   :  { %s948_s0 = smov 256   ;;  %s949_s3 = smov 16  }
  0x22   :  { %31 = dma.hbm_to_vmem [thread:$0]  %s1041_s1, 18432, %s969_s12, [#allocation6], %s948_s0, %s948_s0, %s949_s3  }
  0x23   :  { %940 = dma.done.wait [#allocation3], 128  }
  0x24   :  { %941 = vsyncadd [#allocation3], 4294967168 }
  0x25   :  { %942 = dma.done.wait [#allocation6], 18432  }
  0x26   :  { %943 = vsyncadd [#allocation6], 4294948864  ;;  %v950_v0 = vmov 0.0|0.0   ;;  %vm951_vm0 = vmmov 0   ;;  %v952_v1 = vmov 0.0   ;;  %v39_v2 = vld [vmem:[#allocation5] sm:$0xff] }
  0x27   :  { %731 = vmatprep.subr.bf16.mxu0 %v950_v0  ;;  %677 = vmatprep.mubr.msk.f32.mxu0 %vm951_vm0, %v952_v1  ;;  %v40_v3 = vld [vmem:[#allocation5 + $0x10] sm:$0xff]  ;;  %v118_v6 = vld [vmem:[#allocation5 + $0x40] sm:$0xff]  ;;  %v38_v8 = vld [vmem:[#allocation2] sm:$0xff]  ;;  %vm42_vm1 = vcmask 130048   ;;  %vm122_vm2 = vcmask 261120   ;;  %vm201_vm3 = vcmask 195584  }
  0x28   :  { %734 = vmatprep.subr.bf16.mxu1 %v950_v0  ;;  %688 = vmatprep.mubr.msk.f32.mxu1 %vm951_vm0, %v952_v1  ;;  %v732_v4 = vpack.c.bf16 %v40_v3, %v39_v2  ;;  %v117_v5 = vld [vmem:[#allocation5 + $0x30] sm:$0xff]  ;;  %v120_v10 = vld [vmem:[#allocation5 + $0x60] sm:$0xff]  ;;  %v368_v47 = vld [vmem:[#allocation5 + $0x1a8] sm:$0xff]  ;;  %vm290_vm4 = vcmask 916480   ;;  %s953_s1 = smov [#allocation7]  }
  0x29   :  { %v735_v7 = vpack.c.bf16 %v118_v6, %v117_v5  ;;  %v119_v9 = vld [vmem:[#allocation5 + $0x50] sm:$0xff]  ;;  %v197_v12 = vld [vmem:[#allocation5 + $0x80] sm:$0xff]  ;;  %v370_v48 = vld [vmem:[#allocation5 + $0x1b8] sm:$0xff]  ;;  %s631_s6 = sshll.u32 %s953_s1, 4  ;;  %s632_s6 = int_to_ptr.vmem [resolvable:$true] %s631_s6 }
  0x2a   :  { %733 = vmatpush3.bf16.msra.mxu0 %v732_v4  ;;  %v738_v11 = vpack.c.bf16 %v120_v10, %v119_v9  ;;  %v198_v13 = vld [vmem:[#allocation5 + $0x90] sm:$0xff]  ;;  %v41_v15 = vld [vmem:[#allocation5 + $0x20] ss:$0 sm:$0xff]  ;;  %v764_v49 = vpack.c.bf16 %v370_v48, %v368_v47  ;;  %v372_v54 = vld [vmem:[#allocation5 + $0x1c8] sm:$0xff]  ;;  %s918_s7 = scalar_lea.vmem %s632_s6, 256  ;;  %p923_p3 = scmp.lt.s32.totalorder %s632_s6, %s632_s6 }
  0x2b   :  { %736 = vmatpush3.bf16.msra.mxu1 %v735_v7  ;;  %740 = vmatprep.subr.bf16.mxu0 %v950_v0  ;;  %v741_v14 = vpack.c.bf16 %v198_v13, %v197_v12  ;;  %v199_v20 = vld [vmem:[#allocation5 + $0xa0] sm:$0xff]  ;;  %v121_v21 = vld [vmem:[#allocation5 + $0x70] ss:$0 sm:$0xff]  ;;  %v374_v55 = vld [vmem:[#allocation5 + $0x1d8] sm:$0xff]  ;;  %p919_p2 = scmp.ne.s32.totalorder %s632_s6, %s918_s7  ;;  %p924_p4 = scmp.lt.s32.totalorder %s918_s7, %s918_s7 }
  0x2c   :  { %737 = vmatprep.subr.bf16.mxu1 %v950_v0  ;;  %v276_v22 = vld [vmem:[#allocation5 + $0xc0] sm:$0xff]  ;;  %v277_v23 = vld [vmem:[#allocation5 + $0xd0] sm:$0xff]  ;;  %v768_v60 = vpack.c.bf16 %v374_v55, %v372_v54  ;;  %v376_v63 = vld [vmem:[#allocation5 + $0x1e8] sm:$0xff] }
  0x2d   :  { %678 = vmatmul.mubr.msk.f32.vlgmr.msra.gmra.mrb[0].mxu0 %vm42_vm1, %v38_v8  ;;  %v744_v27 = vpack.c.bf16 %v277_v23, %v276_v22  ;;  %v278_v29 = vld [vmem:[#allocation5 + $0xe0] sm:$0xff]  ;;  %v279_v30 = vld [vmem:[#allocation5 + $0xf0] sm:$0xff]  ;;  %v380_v7 = vld [vmem:[#allocation5 + $0x208] sm:$0xff]  ;;  %p925_p5 = por %p924_p4, %p923_p3 }
  0x2e   :  { %697 = vmatprep.mubr.msk.f32.mxu0 %vm951_vm0, %v952_v1  ;;  %742 = vmatpush3.bf16.msra.mxu0 %v741_v14  ;;  %v747_v31 = vpack.c.bf16 %v279_v30, %v278_v29  ;;  %v280_v32 = vld [vmem:[#allocation5 + $0x100] sm:$0xff]  ;;  %v281_v33 = vld [vmem:[#allocation5 + $0x110] sm:$0xff]  ;;  %v382_v8 = vld [vmem:[#allocation5 + $0x218] sm:$0xff] }
  0x2f   :  { %739 = vmatpush3.bf16.msra.mxu1 %v738_v11  ;;  %695 = vmatprep.subr.mxu0 %v952_v1  ;;  %v750_v34 = vpack.c.bf16 %v281_v33, %v280_v32  ;;  %v282_v35 = vld [vmem:[#allocation5 + $0x120] sm:$0xff]  ;;  %v283_v36 = vld [vmem:[#allocation5 + $0x130] sm:$0xff]  ;;  %v776_v9 = vpack.c.bf16 %v382_v8, %v380_v7  ;;  %v384_v13 = vld [vmem:[#allocation5 + $0x228] sm:$0xff]  ;;  %p926_p6 = pnand %p925_p5, %p919_p2 }
  0x30   :  { %v753_v37 = vpack.c.bf16 %v283_v36, %v282_v35  ;;  %v284_v38 = vld [vmem:[#allocation5 + $0x140] sm:$0xff]  ;;  %v285_v39 = vld [vmem:[#allocation5 + $0x150] sm:$0xff]  ;;  %v386_v14 = vld [vmem:[#allocation5 + $0x238] sm:$0xff] }
  0x31   :  { %v756_v40 = vpack.c.bf16 %v285_v39, %v284_v38  ;;  %v286_v41 = vld [vmem:[#allocation5 + $0x160] sm:$0xff]  ;;  %v287_v42 = vld [vmem:[#allocation5 + $0x170] sm:$0xff]  ;;  %v392_v23 = vld [vmem:[#allocation5 + $0x268] sm:$0xff] }
  0x32   :  { %696 = vmatpush3.msra.mxu0 %v199_v20  ;;  %v759_v43 = vpack.c.bf16 %v287_v42, %v286_v41  ;;  %v288_v44 = vld [vmem:[#allocation5 + $0x180] sm:$0xff]  ;;  %v289_v45 = vld [vmem:[#allocation5 + $0x190] sm:$0xff]  ;;  %v481_v35 = vld [vmem:[#allocation5 + $0x288] sm:$0xff] }
  0x33   :  { %743 = vmatprep.subr.bf16.mxu0 %v950_v0  ;;  %v762_v46 = vpack.c.bf16 %v289_v45, %v288_v44  ;;  %v200_v50 = vld [vmem:[#allocation5 + $0xb0] ss:$0 sm:$0xff]  ;;  %v367_v51 = vld [vmem:[#allocation5 + $0x1a0] sm:$0xff]  ;;  %v483_v36 = vld [vmem:[#allocation5 + $0x298] sm:$0xff] }
  0x34   :  { %v369_v52 = vld [vmem:[#allocation5 + $0x1b0] sm:$0xff]  ;;  %v371_v61 = vld [vmem:[#allocation5 + $0x1c0] sm:$0xff]  ;;  %v792_v38 = vpack.c.bf16 %v483_v36, %v481_v35  ;;  %v487_v41 = vld [vmem:[#allocation5 + $0x2b8] sm:$0xff] }
  0x35   :  { %v766_v58 = vpack.c.bf16 %v369_v52, %v367_v51  ;;  %v373_v62 = vld [vmem:[#allocation5 + $0x1d0] sm:$0xff]  ;;  %v375_v4 = vld [vmem:[#allocation5 + $0x1e0] sm:$0xff]  ;;  %v491_v47 = vld [vmem:[#allocation5 + $0x2d8] sm:$0xff] }
  0x36   :  { %v770_v2 = vpack.c.bf16 %v373_v62, %v371_v61  ;;  %v377_v5 = vld [vmem:[#allocation5 + $0x1f0] sm:$0xff]  ;;  %v379_v10 = vld [vmem:[#allocation5 + $0x200] sm:$0xff]  ;;  %793 = vmatprep.subr.bf16.mxu1 %v792_v38  ;;  %v493_v52 = vld [vmem:[#allocation5 + $0x2e8] sm:$0xff] }
  0x37   :  { %v774_v6 = vpack.c.bf16 %v377_v5, %v375_v4  ;;  %v381_v11 = vld [vmem:[#allocation5 + $0x210] sm:$0xff]  ;;  %v387_v20 = vld [vmem:[#allocation5 + $0x240] sm:$0xff]  ;;  %v505_v7 = vld [vmem:[#allocation5 + $0x348] sm:$0xff] }
  0x38   :  { %v778_v12 = vpack.c.bf16 %v381_v11, %v379_v10  ;;  %v389_v22 = vld [vmem:[#allocation5 + $0x250] sm:$0xff]  ;;  %v484_v44 = vld [vmem:[#allocation5 + $0x2a0] sm:$0xff]  ;;  %v507_v8 = vld [vmem:[#allocation5 + $0x358] sm:$0xff] }
  0x39   :  { %v482_v39 = vld [vmem:[#allocation5 + $0x290] sm:$0xff]  ;;  %v496_v62 = vld [vmem:[#allocation5 + $0x300] sm:$0xff]  ;;  %v816_v10 = vpack.c.bf16 %v507_v8, %v505_v7  ;;  %v525_v36 = vld [vmem:[#allocation5 + $0x3e8] sm:$0xff] }
  0x3a   :  { %v486_v45 = vld [vmem:[#allocation5 + $0x2b0] sm:$0xff]  ;;  %v500_v5 = vld [vmem:[#allocation5 + $0x320] sm:$0xff] }
  0x3b   :  { %v798_v48 = vpack.c.bf16 %v486_v45, %v484_v44  ;;  %v490_v51 = vld [vmem:[#allocation5 + $0x2d0] sm:$0xff]  ;;  %v504_v11 = vld [vmem:[#allocation5 + $0x340] sm:$0xff] }
  0x3c   :  { %v522_v35 = vld [vmem:[#allocation5 + $0x3d0] sm:$0xff] }
  0x3d   :  { %v542_v7 = vld [vmem:[#allocation5 + $0x470] sm:$0xff] }
 0x100   :  { %v112_v16 = vpop.f32.mrb[0].mxu0 }
 0x101   :  { %v113_v17 = vadd.f32 %v112_v16, %v41_v15  ;;  %v679_v18 = vpop.f32.mrb[1].mxu0  ;;  %v780_v15 = vpack.c.bf16 %v386_v14, %v384_v13  ;;  %v385_v16 = vld [vmem:[#allocation5 + $0x230] sm:$0xff]  ;;  %v509_v13 = vld [vmem:[#allocation5 + $0x368] sm:$0xff]  ;;  %v511_v14 = vld [vmem:[#allocation5 + $0x378] sm:$0xff] }
 0x102   :  { %v388_v18 = vld [vmem:[#allocation5 + $0x248] sm:$0xff] }
 0x103   :  { %v116_v19 = vmax.f32 %v113_v17, 0.0 }
 0x105   :  { %689 = vmatmul.mubr.msk.f32.vlgmr.msra.gmra.mrb[0].mxu1 %vm122_vm2, %v116_v19  ;;  %v390_v19 = vld [vmem:[#allocation5 + $0x258] sm:$0xff] }
 0x1d8   :  { %v192_v24 = vpop.f32.mrb[0].mxu1 }
 0x1d9   :  { %v193_v25 = vadd.f32 %v192_v24, %v121_v21  ;;  %v690_v26 = vpop.f32.mrb[1].mxu1  ;;  %v784_v21 = vpack.c.bf16 %v390_v19, %v388_v18  ;;  %v394_v24 = vld [vmem:[#allocation5 + $0x278] sm:$0xff]  ;;  %v513_v18 = vld [vmem:[#allocation5 + $0x388] sm:$0xff] }
 0x1da   :  { %v788_v26 = vpack.c.bf16 %v394_v24, %v392_v23  ;;  %v515_v19 = vld [vmem:[#allocation5 + $0x398] sm:$0xff]  ;;  %v514_v23 = vld [vmem:[#allocation5 + $0x390] sm:$0xff]  ;;  %v517_v24 = vld [vmem:[#allocation5 + $0x3a8] sm:$0xff] }
 0x1db   :  { %v196_v28 = vmax.f32 %v193_v25, 0.0  ;;  %v786_v25 = vpack.c.bf16 %v389_v22, %v387_v20  ;;  %v512_v22 = vld [vmem:[#allocation5 + $0x380] sm:$0xff] }
 0x1dd   :  { %698 = vmatmul.mubr.msk.f32.vlgmr.msra.gmra.mrb[2].mxu0 %vm201_vm3, %v196_v28  ;;  %v393_v28 = vld [vmem:[#allocation5 + $0x270] sm:$0xff] }
 0x1de   :  { %745 = vmatpush3.bf16.msra.mxu0 %v744_v27  ;;  %728 = vmatprep.mubr.msk.f32.mxu0 %vm951_vm0, %v952_v1  ;;  %v391_v27 = vld [vmem:[#allocation5 + $0x260] sm:$0xff] }
 0x1df   :  { %746 = vmatprep.subr.bf16.mxu0 %v950_v0  ;;  %v790_v29 = vpack.c.bf16 %v393_v28, %v391_v27  ;;  %v516_v28 = vld [vmem:[#allocation5 + $0x3a0] sm:$0xff] }
 0x1e2   :  { %748 = vmatpush3.bf16.msra.mxu0 %v747_v31 }
 0x1e3   :  { %749 = vmatprep.subr.bf16.mxu0 %v950_v0 }
 0x1e6   :  { %751 = vmatpush3.bf16.msra.mxu0 %v750_v34 }
 0x1e7   :  { %752 = vmatprep.subr.bf16.mxu0 %v950_v0 }
 0x1ea   :  { %754 = vmatpush3.bf16.msra.mxu0 %v753_v37  ;;  %v480_v37 = vld [vmem:[#allocation5 + $0x280] sm:$0xff] }
 0x1eb   :  { %755 = vmatprep.subr.bf16.mxu0 %v950_v0  ;;  %v794_v42 = vpack.c.bf16 %v482_v39, %v480_v37  ;;  %v527_v37 = vld [vmem:[#allocation5 + $0x3f8] sm:$0xff] }
 0x1ec   :  { %v836_v39 = vpack.c.bf16 %v527_v37, %v525_v36 }
 0x1ed   :  { %795 = vmatpush1.bf16.msra.mxu1 %v794_v42 }
 0x1ee   :  { %757 = vmatpush3.bf16.msra.mxu0 %v756_v40  ;;  %v485_v40 = vld [vmem:[#allocation5 + $0x2a8] sm:$0xff] }
 0x1ef   :  { %758 = vmatprep.subr.bf16.mxu0 %v950_v0 }
 0x1f2   :  { %760 = vmatpush3.bf16.msra.mxu0 %v759_v43  ;;  %v796_v43 = vpack.c.bf16 %v487_v41, %v485_v40  ;;  %v524_v40 = vld [vmem:[#allocation5 + $0x3e0] sm:$0xff]  ;;  %v526_v41 = vld [vmem:[#allocation5 + $0x3f0] sm:$0xff] }
 0x1f3   :  { %761 = vmatprep.subr.bf16.mxu0 %v950_v0  ;;  %v378_v0 = vld [vmem:[#allocation5 + $0x1f8] sm:$0xff]  ;;  %v838_v42 = vpack.c.bf16 %v526_v41, %v524_v40 }
 0x1f4   :  { %v772_v3 = vpack.c.bf16 %v378_v0, %v376_v63  ;;  %797 = vmatprep.subr.bf16.mxu1 %v796_v43  ;;  %v498_v63 = vld [vmem:[#allocation5 + $0x310] sm:$0xff]  ;;  %v501_v0 = vld [vmem:[#allocation5 + $0x328] sm:$0xff] }
 0x1f5   :  { %799 = vmatpush1.bf16.msra.mxu1 %v798_v48  ;;  %v529_v48 = vld [vmem:[#allocation5 + $0x408] sm:$0xff] }
 0x1f6   :  { %763 = vmatpush3.bf16.msra.mxu0 %v762_v46  ;;  %v489_v46 = vld [vmem:[#allocation5 + $0x2c8] sm:$0xff] }
 0x1f7   :  { %765 = vmatprep.subr.bf16.mxu0 %v764_v49  ;;  %v800_v49 = vpack.c.bf16 %v491_v47, %v489_v46 }
 0x1f9   :  { %801 = vmatprep.subr.bf16.mxu1 %v800_v49  ;;  %v531_v49 = vld [vmem:[#allocation5 + $0x418] sm:$0xff] }
 0x2b0   :  { %v271_v53 = vpop.f32.mrb[2].mxu0 }
 0x2b1   :  { %v272_v56 = vadd.f32 %v271_v53, %v200_v50  ;;  %v699_v57 = vpop.f32.mrb[3].mxu0  ;;  %v488_v50 = vld [vmem:[#allocation5 + $0x2c0] sm:$0xff]  ;;  %v495_v53 = vld [vmem:[#allocation5 + $0x2f8] sm:$0xff] }
 0x2b2   :  { %v802_v54 = vpack.c.bf16 %v490_v51, %v488_v50  ;;  %v804_v55 = vpack.c.bf16 %v495_v53, %v493_v52  ;;  %v494_v57 = vld [vmem:[#allocation5 + $0x2f0] sm:$0xff]  ;;  %v840_v50 = vpack.c.bf16 %v531_v49, %v529_v48  ;;  %v528_v51 = vld [vmem:[#allocation5 + $0x400] sm:$0xff] }
 0x2b3   :  { %v275_v59 = vmul.f32 %v272_v56, %v272_v56  ;;  %v530_v52 = vld [vmem:[#allocation5 + $0x410] sm:$0xff] }
 0x2b4   :  { %803 = vmatpush1.bf16.msra.mxu1 %v802_v54  ;;  %v842_v53 = vpack.c.bf16 %v530_v52, %v528_v51  ;;  %v533_v54 = vld [vmem:[#allocation5 + $0x428] sm:$0xff] }
 0x2b5   :  { %729 = vmatmul.mubr.msk.f32.vlgmr.msra.gmra.mrb[4].mxu0 %vm290_vm4, %v275_v59  ;;  %v499_v59 = vld [vmem:[#allocation5 + $0x318] sm:$0xff]  ;;  %805 = vmatprep.subr.bf16.mxu1 %v804_v55 }
 0x2b6   :  { %767 = vmatpush1.bf16.msra.mxu0 %v766_v58  ;;  %462 = vmatprep.mubr.f32.mxu0 %v952_v1  ;;  %v383_v1 = vld [vmem:[#allocation5 + $0x220] sm:$0xff]  ;;  %v497_v58 = vld [vmem:[#allocation5 + $0x308] sm:$0xff]  ;;  %v535_v55 = vld [vmem:[#allocation5 + $0x438] sm:$0xff] }
 0x2b7   :  { %769 = vmatprep.subr.bf16.mxu0 %v768_v60  ;;  %v782_v17 = vpack.c.bf16 %v385_v16, %v383_v1  ;;  %v808_v61 = vpack.c.bf16 %v499_v59, %v497_v58  ;;  %v820_v1 = vpack.c.bf16 %v511_v14, %v509_v13  ;;  %v508_v16 = vld [vmem:[#allocation5 + $0x360] sm:$0xff]  ;;  %v534_v58 = vld [vmem:[#allocation5 + $0x430] sm:$0xff] }
 0x2ba   :  { %771 = vmatpush1.bf16.msra.mxu0 %v770_v2  ;;  %v503_v2 = vld [vmem:[#allocation5 + $0x338] sm:$0xff] }
 0x2bb   :  { %773 = vmatprep.subr.bf16.mxu0 %v772_v3  ;;  %v810_v3 = vpack.c.bf16 %v498_v63, %v496_v62  ;;  %v812_v4 = vpack.c.bf16 %v503_v2, %v501_v0  ;;  %v536_v62 = vld [vmem:[#allocation5 + $0x440] sm:$0xff]  ;;  %v538_v0 = vld [vmem:[#allocation5 + $0x450] sm:$0xff]  ;;  %v541_v2 = vld [vmem:[#allocation5 + $0x468] sm:$0xff] }
 0x2be   :  { %775 = vmatpush1.bf16.msra.mxu0 %v774_v6  ;;  %v502_v6 = vld [vmem:[#allocation5 + $0x330] sm:$0xff] }
 0x2bf   :  { %777 = vmatprep.subr.bf16.mxu0 %v776_v9  ;;  %v814_v9 = vpack.c.bf16 %v502_v6, %v500_v5  ;;  %v540_v6 = vld [vmem:[#allocation5 + $0x460] sm:$0xff] }
 0x2c0   :  { %v854_v8 = vpack.c.bf16 %v542_v7, %v540_v6 }
 0x2c2   :  { %779 = vmatpush1.bf16.msra.mxu0 %v778_v12  ;;  %v506_v12 = vld [vmem:[#allocation5 + $0x350] sm:$0xff] }
 0x2c3   :  { %781 = vmatprep.subr.bf16.mxu0 %v780_v15  ;;  %v818_v15 = vpack.c.bf16 %v506_v12, %v504_v11 }
 0x2c6   :  { %783 = vmatpush1.bf16.msra.mxu0 %v782_v17  ;;  %v510_v17 = vld [vmem:[#allocation5 + $0x370] sm:$0xff] }
 0x2c7   :  { %785 = vmatprep.subr.bf16.mxu0 %v784_v21  ;;  %v822_v20 = vpack.c.bf16 %v510_v17, %v508_v16  ;;  %v824_v21 = vpack.c.bf16 %v515_v19, %v513_v18 }
 0x2ca   :  { %787 = vmatpush1.bf16.msra.mxu0 %v786_v25  ;;  %v519_v25 = vld [vmem:[#allocation5 + $0x3b8] sm:$0xff] }
 0x2cb   :  { %789 = vmatprep.subr.bf16.mxu0 %v788_v26  ;;  %v826_v26 = vpack.c.bf16 %v514_v23, %v512_v22  ;;  %v828_v27 = vpack.c.bf16 %v519_v25, %v517_v24 }
 0x2ce   :  { %791 = vmatpush1.bf16.msra.mxu0 %v790_v29  ;;  %v518_v29 = vld [vmem:[#allocation5 + $0x3b0] sm:$0xff] }
 0x388   :  { %v360_v30 = vpop.f32.mrb[4].mxu0 }
 0x389   :  { %v364_v31 = vmax.f32 %v360_v30, 1e-24  ;;  %v730_v32 = vpop.f32.mrb[5].mxu0  ;;  %v521_v30 = vld [vmem:[#allocation5 + $0x3c8] sm:$0xff] }
 0x38a   :  { %v830_v32 = vpack.c.bf16 %v518_v29, %v516_v28 }
 0x38b   :  { %864 = vrsqrt.f32 %v364_v31  ;;  %v523_v31 = vld [vmem:[#allocation5 + $0x3d8] sm:$0xff] }
 0x395   :  { %v865_v33 = vpop.eup %864 }
 0x396   :  { %v366_v34 = vmul.f32 %v865_v33, %v272_v56  ;;  %v492_v56 = vld [vmem:[#allocation5 + $0x2e0] sm:$0xff]  ;;  %v832_v33 = vpack.c.bf16 %v523_v31, %v521_v30 }
 0x397   :  { %v806_v60 = vpack.c.bf16 %v494_v57, %v492_v56  ;;  %v844_v56 = vpack.c.bf16 %v535_v55, %v533_v54  ;;  %v532_v57 = vld [vmem:[#allocation5 + $0x420] sm:$0xff] }
 0x398   :  { %645 = vmatmul.mubr.msk.f32.vlgmr.msra.gmra.mrb[6].mxu0 %vm290_vm4, %v366_v34  ;;  %v520_v34 = vld [vmem:[#allocation5 + $0x3c0] sm:$0xff]  ;;  %v846_v59 = vpack.c.bf16 %v534_v58, %v532_v57 }
 0x399   :  { %807 = vmatpush1.bf16.msra.mxu1 %v806_v60  ;;  %v834_v38 = vpack.c.bf16 %v522_v35, %v520_v34  ;;  %v537_v60 = vld [vmem:[#allocation5 + $0x448] sm:$0xff] }
 0x39a   :  { %809 = vmatprep.subr.bf16.mxu1 %v808_v61  ;;  %v539_v61 = vld [vmem:[#allocation5 + $0x458] sm:$0xff] }
 0x39b   :  { %v848_v63 = vpack.c.bf16 %v539_v61, %v537_v60 }
 0x39d   :  { %811 = vmatpush1.bf16.msra.mxu1 %v810_v3  ;;  %v543_v3 = vld [vmem:[#allocation5 + $0x478] sm:$0xff] }
 0x39e   :  { %813 = vmatprep.subr.bf16.mxu1 %v812_v4  ;;  %v850_v4 = vpack.c.bf16 %v538_v0, %v536_v62  ;;  %v852_v5 = vpack.c.bf16 %v543_v3, %v541_v2 }
 0x3a1   :  { %815 = vmatpush1.bf16.msra.mxu1 %v814_v9 }
 0x3a2   :  { %817 = vmatprep.subr.bf16.mxu1 %v816_v10 }
 0x3a5   :  { %819 = vmatpush1.bf16.msra.mxu1 %v818_v15 }
 0x3a6   :  { %821 = vmatprep.subr.bf16.mxu1 %v820_v1 }
 0x3a9   :  { %823 = vmatpush1.bf16.msra.mxu1 %v822_v20 }
 0x3aa   :  { %825 = vmatprep.subr.bf16.mxu1 %v824_v21 }
 0x3ad   :  { %827 = vmatpush1.bf16.msra.mxu1 %v826_v26 }
 0x3ae   :  { %829 = vmatprep.subr.bf16.mxu1 %v828_v27 }
 0x3b1   :  { %831 = vmatpush1.bf16.msra.mxu1 %v830_v32 }
 0x3b2   :  { %833 = vmatprep.subr.bf16.mxu1 %v832_v33 }
 0x3b5   :  { %835 = vmatpush1.bf16.msra.mxu1 %v834_v38 }
 0x3b6   :  { %837 = vmatprep.subr.bf16.mxu1 %v836_v39 }
 0x3b9   :  { %839 = vmatpush1.bf16.msra.mxu1 %v838_v42 }
 0x3ba   :  { %841 = vmatprep.subr.bf16.mxu1 %v840_v50 }
 0x3bd   :  { %843 = vmatpush1.bf16.msra.mxu1 %v842_v53 }
 0x3be   :  { %845 = vmatprep.subr.bf16.mxu1 %v844_v56 }
 0x3c1   :  { %847 = vmatpush1.bf16.msra.mxu1 %v846_v59 }
 0x3c2   :  { %849 = vmatprep.subr.bf16.mxu1 %v848_v63 }
 0x3c5   :  { %851 = vmatpush1.bf16.msra.mxu1 %v850_v4 }
 0x3c6   :  { %853 = vmatprep.subr.bf16.mxu1 %v852_v5 }
 0x3c9   :  { %855 = vmatpush1.bf16.msra.mxu1 %v854_v8 }
 0x46b   :  { %v464_v43 = vpop.f32.mrb[6].mxu0 }
 0x46c   :  { %v1023_v44 = vmul.f32 2.0, %v464_v43  ;;  %v466_v45 = vpop.f32.mrb[7].mxu0 }
 0x46d   :  { %v470_v46 = vmul.f32 2.0, %v466_v45 }
 0x46f   :  { %v471_v47 = vmax.f32 %v1023_v44, %v470_v46 }
 0x471   :  { %472 = vmax.xlane.f32.xlu0 %v471_v47 }
 0x4fe   :  { %v473_v9 = vpop.xlane.xlu0 %472 }
 0x4ff   :  { %v474_v10 = vsub.f32 %v1023_v44, %v473_v9  ;;  %v475_v11 = vsub.f32 %v470_v46, %v473_v9 }
 0x501   :  { %v476_v12 = vmul.f32 1.442695, %v474_v10  ;;  %v478_v13 = vmul.f32 1.442695, %v475_v11 }
 0x503   :  { %866 = vpow2.f32 %v476_v12 }
 0x504   :  { %868 = vpow2.f32 %v478_v13 }
 0x50d   :  { %v867_v14 = vpop.eup %866 }
 0x50e   :  { %v869_v15 = vpop.eup %868 }
 0x50f   :  { %608 = vmatprep.mubr.f32.mxu1 %v869_v15 }
 0x510   :  { %609 = vmatmul.mubr.f32.vlgmr.msra.gmra.mrb[2].mxu1 %v867_v14 }
 0x5e3   :  { %v610_v1 = vpop.f32.mrb[2].mxu1 }
 0x5e4   :  { %870 = vlog2.f32 %v610_v1  ;;  %v612_v16 = vpop.f32.mrb[3].mxu1 }
 0x5e5   :  { %872 = vlog2.f32 %v612_v16 }
 0x5ee   :  { %v871_v17 = vpop.eup %870 }
 0x5ef   :  { %v873_v18 = vpop.eup %872  ;;  %v616_v19 = vmul.f32 0.6931472, %v871_v17 }
 0x5f0   :  { %v618_v20 = vmul.f32 0.6931472, %v873_v18 }
 0x5f1   :  { %v619_v21 = vadd.f32 %v616_v19, %v473_v9 }
 0x5f2   :  { %v620_v22 = vadd.f32 %v618_v20, %v473_v9 }
 0x5f3   :  { %v621_v23 = vsub.f32 %v1023_v44, %v619_v21 }
 0x5f4   :  { %v622_v24 = vsub.f32 %v470_v46, %v620_v22 }
 0x5f5   :  { %623 = vst [vmem:[#allocation7] sm:$0xff] %v621_v23 }
 0x5f6   :  { %624 = vst [vmem:[#allocation7 + $0x8] sm:$0xff] %v622_v24 }
 0x5f7   :  { %929 = shalt.err (!%p926_p6)
}
 0x5f8   :  { %s930_s10 = scalar_lea.hbm %s1042_s2, 256 }
 0x5f9   :  { %p931_p7 = scmp.ne.s32.totalorder %s1042_s2, %s930_s10  ;;  %p934_p8 = scmp.lt.u32.totalorder %s930_s10, %s1042_s2 }
 0x5fb   :  { %p936_p9 = pnand %p934_p8, %p931_p7 }
 0x5fd   :  { %939 = shalt.err (!%p936_p9)
}
 0x5fe   :  { %634 = dma.vmem_to_hbm [thread:$0]  %s632_s6, 256, %s1042_s2, [#allocation4]  }
 0x5ff   :  { %944 = dma.done.wait [#allocation4], 256  }
 0x600   :  { %945 = vsyncadd [#allocation4], 4294967040 }
 0x601   :  { %638 = vsyncpa [#allocation3], 1 }
 0x602   :  { %639 = vsyncpa [#allocation6], 1 }
 0x603   :  { %640 = vsyncpa [#allocation4], 1 }

</bundles_post_ra>
